<compile_context>
chip_gen: v7x
topology: tpu7x:2x2x1
jax: 0.10.0
libtpu: 0.0.40
codegen_flags: <defaults>
</compile_context>

<pallas_src>
import functools
import math

import jax
import jax.numpy as jnp
from jax.experimental import pallas as pl
from jax.experimental.pallas import tpu as pltpu

_NEG_LARGE = -1e30  # masks padded output columns out of the softmax


def _round_up(a: int, b: int) -> int:
    return ((a + b - 1) // b) * b


def _mxu_dtype(dtype):
    # Feed the MXU in bf16 when inputs arrive as f32 (f32 accumulation keeps
    # the softmax math accurate); other dtypes pass through unchanged.
    return jnp.bfloat16 if jnp.dtype(dtype) == jnp.dtype(jnp.float32) else dtype


def _softmax_layer_kernel(x_ref, w_ref, b_ref, o_ref, acc_ref, *, log):
    # x_ref: (TILE_M, TILE_K) compute dtype     w_ref: (TILE_K, Np) compute dtype
    # b_ref: (1, Np) f32                        o_ref: (TILE_M, Np) out dtype
    # acc_ref: (TILE_M, Np) f32 scratch accumulator (lives across the K axis)
    k_idx = pl.program_id(1)

    @pl.when(k_idx == 0)
    def _():
        acc_ref[...] = jnp.zeros_like(acc_ref)

    # MXU matmul with f32 accumulation.
    acc_ref[...] += jnp.dot(x_ref[...], w_ref[...],
                            preferred_element_type=jnp.float32)

    @pl.when(k_idx == pl.num_programs(1) - 1)
    def _():
        # Epilogue: bias add + numerically-stable (log-)softmax, all in f32.
        z = acc_ref[...] + b_ref[...]
        m = jnp.max(z, axis=-1, keepdims=True)
        shifted = z - m
        e = jnp.exp(shifted)
        denom = jnp.sum(e, axis=-1, keepdims=True)
        if log:
            out = shifted - jnp.log(denom)
        else:
            # Exact reciprocal: approx=True (~2^-12 rel err) broke row sums.
            out = e * pl.reciprocal(denom, approx=False)
        o_ref[...] = out.astype(o_ref.dtype)


def prepare_softmax_layer_params(weight, bias, *, compute_dtype=None,
                                 weight_tile_budget_bytes=8 * 1024 * 1024):
    """One-time parameter prep (hoisted out of the forward path).

    weight: [out_dims, in_dims] (PyTorch nn.Linear layout), bias: [out_dims].
    Returns a dict with the pre-transposed, padded, MXU-dtype weight (Kp, Np),
    the padded f32 bias (1, Np), and the chosen K tile.
    """
    n, k = weight.shape
    if compute_dtype is None:
        compute_dtype = _mxu_dtype(weight.dtype)
    w_isz = jnp.dtype(compute_dtype).itemsize

    n_pad = _round_up(n, 128)
    # Largest lane-aligned K tile whose (tile_k, Np) weight slab fits the budget.
    max_tile_k = max(128, (weight_tile_budget_bytes // (n_pad * w_isz)) // 128 * 128)
    tile_k = min(_round_up(k, 128), max_tile_k)
    k_pad = _round_up(k, tile_k)

    w_kn = weight.T.astype(compute_dtype)          # (K, N) so no in-kernel transpose
    if k_pad != k or n_pad != n:
        w_kn = jnp.pad(w_kn, ((0, k_pad - k), (0, n_pad - n)))

    # Padded output columns get a huge negative bias -> exp underflows to 0.
    b2d = bias.reshape(1, n).astype(jnp.float32)
    if n_pad != n:
        b2d = jnp.pad(b2d, ((0, 0), (0, n_pad - n)), constant_values=_NEG_LARGE)

    return dict(w_kn=w_kn, b2d=b2d, k=k, n=n, k_pad=k_pad, n_pad=n_pad,
                tile_k=tile_k, compute_dtype=compute_dtype)


def _choose_tile_m(m, n_pad, tile_m_cap):
    # (a) keep ~5-6 f32 (tile_m, Np) epilogue slabs inside ~24 MiB of VMEM,
    # (b) give the M grid >= ~4 steps when M allows (software pipelining),
    # (c) respect the caller cap (default 256 for v7x's 64-MiB VMEM).
    epi_budget = 24 * 1024 * 1024
    by_vmem = max(8, (epi_budget // (24 * n_pad)) // 8 * 8)
    by_pipeline = max(8, _round_up(-(-m // 4), 8))
    return max(8, min(tile_m_cap, by_vmem, by_pipeline))


def softmax_layer(x, params, log=True, tile_m_cap=256):
    """Forward pass: (log_)softmax(x @ W.T + b) over the last dim.

    x: [..., in_dims]; params from prepare_softmax_layer_params().
    """
    *lead, k = x.shape
    assert k == params["k"], f"expected in_dims={params['k']}, got {k}"
    n, n_pad = params["n"], params["n_pad"]
    k_pad, tile_k = params["k_pad"], params["tile_k"]
    compute_dtype = params["compute_dtype"]
    w_kn, b2d = params["w_kn"], params["b2d"]

    out_dtype = x.dtype
    m = int(math.prod(lead)) if lead else 1
    if m == 0:  # degenerate leading dims
        return jnp.zeros((*lead, n), dtype=out_dtype)

    tile_m = _choose_tile_m(m, n_pad, tile_m_cap)
    m_pad = _round_up(m, tile_m)

    x2d = x.reshape(m, k).astype(compute_dtype)
    if m_pad != m or k_pad != k:
        x2d = jnp.pad(x2d, ((0, m_pad - m), (0, k_pad - k)))

    grid = (m_pad // tile_m, k_pad // tile_k)

    c_isz = jnp.dtype(compute_dtype).itemsize
    o_isz = jnp.dtype(out_dtype).itemsize

    # Weight spec: when it is fully resident (single K step) and large, request
    # single buffering so the fixed VMEM cost is halved (matters on v7x).
    w_bytes = k_pad * n_pad * c_isz
    single_buffer_w = (grid[1] == 1) and (w_bytes > 2 * 1024 * 1024)
    if single_buffer_w:
        w_spec = pl.BlockSpec((tile_k, n_pad), lambda i, kk: (kk, 0),
                              pipeline_mode=pl.Buffered(1))
    else:
        w_spec = pl.BlockSpec((tile_k, n_pad), lambda i, kk: (kk, 0))

    est_vmem = (2 * tile_m * tile_k * c_isz                       # x double buffer
                + (1 if single_buffer_w else 2) * tile_k * n_pad * c_isz  # weight
                + 2 * n_pad * 4                                   # bias
                + 2 * tile_m * n_pad * o_isz                      # out double buffer
                + 5 * tile_m * n_pad * 4)                         # acc + f32 temps
    vmem_limit = int(min(64 * 1024 * 1024, max(16 * 1024 * 1024, 2 * est_vmem)))

    cost = pl.CostEstimate(
        flops=2 * m_pad * n_pad * k_pad,
        transcendentals=m_pad * n_pad,   # exp per output element
        bytes_accessed=(m_pad * k_pad * c_isz
                        + k_pad * n_pad * c_isz
                        + m_pad * n_pad * o_isz),
    )

    out2d = pl.pallas_call(
        functools.partial(_softmax_layer_kernel, log=log),
        out_shape=jax.ShapeDtypeStruct((m_pad, n_pad), out_dtype),
        grid=grid,
        in_specs=[
            pl.BlockSpec((tile_m, tile_k), lambda i, kk: (i, kk)),  # x tile
            w_spec,                                                 # weight tile
            pl.BlockSpec((1, n_pad), lambda i, kk: (0, 0)),         # resident bias
        ],
        out_specs=pl.BlockSpec((tile_m, n_pad), lambda i, kk: (i, 0)),
        scratch_shapes=[pltpu.VMEM((tile_m, n_pad), jnp.float32)],  # f32 accumulator
        compiler_params=pltpu.CompilerParams(
            dimension_semantics=("parallel", "arbitrary"),
            vmem_limit_bytes=vmem_limit,
        ),
        cost_estimate=cost,
    )(x2d, w_kn, b2d)

    out2d = out2d[:m, :n]
    return out2d.reshape(*lead, n)


if __name__ == "__main__":
    # Shapes implied by the module: Linear(input_dims -> output_dims).
    batch, seq, input_dims, output_dims = 2, 8, 32, 16

    key = jax.random.PRNGKey(0)
    kx, kw, kb = jax.random.split(key, 3)

    x = jax.random.normal(kx, (batch, seq, input_dims), dtype=jnp.float32)
    # Deterministic init mimicking nn.Linear's uniform(-1/sqrt(fan_in), +1/sqrt(fan_in)).
    bound = 1.0 / math.sqrt(input_dims)
    weight = jax.random.uniform(kw, (output_dims, input_dims),
                                minval=-bound, maxval=bound, dtype=jnp.float32)
    bias = jax.random.uniform(kb, (output_dims,),
                              minval=-bound, maxval=bound, dtype=jnp.float32)

    params = prepare_softmax_layer_params(weight, bias)

    out_log = softmax_layer(x, params, log=True)     # module default: log_softmax
    jax.block_until_ready(out_log)
    out_sm = softmax_layer(x, params, log=False)     # softmax path
    jax.block_until_ready(out_sm)
    assert out_log.shape == (batch, seq, output_dims)
    assert out_sm.shape == (batch, seq, output_dims)

    # Reference using the same bf16-MXU / f32-accumulate precision as the kernel.
    logits = jnp.dot(x.astype(jnp.bfloat16), weight.T.astype(jnp.bfloat16),
                     preferred_element_type=jnp.float32) + bias.astype(jnp.float32)
    ref_log = jax.nn.log_softmax(logits, axis=-1)
    ref_sm = jax.nn.softmax(logits, axis=-1)
    assert jnp.allclose(out_log, ref_log, atol=1e-4, rtol=1e-4)
    assert jnp.allclose(out_sm, ref_sm, atol=1e-4, rtol=1e-4)
    assert jnp.allclose(jnp.sum(out_sm, axis=-1), 1.0, atol=1e-4)

    # Loose check against full-f32 math (only bf16 MXU rounding separates them).
    ref_log_f32 = jax.nn.log_softmax(x @ weight.T + bias, axis=-1)
    assert jnp.allclose(out_log, ref_log_f32, atol=5e-2, rtol=5e-2)

    print("KERNEL_OK")
</pallas_src>

<mosaic_0001>
module attributes {stable_mosaic.version = 11 : i64} {
  func.func @_softmax_layer_kernel(%arg0: i32, %arg1: i32, %arg2: memref<8x128xbf16, #tpu.memory_space<vmem>>, %arg3: memref<128x128xbf16, #tpu.memory_space<vmem>>, %arg4: memref<1x128xf32, #tpu.memory_space<vmem>>, %arg5: memref<8x128xf32, #tpu.memory_space<vmem>>, %arg6: memref<8x128xf32, #tpu.memory_space<vmem>>) attributes {dimension_semantics = [#tpu.dimension_semantics<parallel>, #tpu.dimension_semantics<arbitrary>], iteration_bounds = array<i64: 2, 1>, scalar_prefetch = 0 : i64, scratch_operands = 1 : i64, tpu.core_type = #tpu.core_type<tc>, window_params = [{transform_indices = @transform_0, window_bounds = array<i64: 8, 128>}, {transform_indices = @transform_1, window_bounds = array<i64: 128, 128>}, {pipeline_mode = #tpu.pipeline_mode<synchronous>, transform_indices = @transform_2, window_bounds = array<i64: 1, 128>}, {transform_indices = @transform_3, window_bounds = array<i64: 8, 128>}]} {
    %c0_i32 = arith.constant 0 : i32
    %0 = arith.cmpi eq, %arg1, %c0_i32 : i32
    %1 = arith.extui %0 : i1 to i32
    %c0_i32_0 = arith.constant 0 : i32
    %2 = arith.cmpi ne, %1, %c0_i32_0 : i32
    scf.if %2 {
      %cst_10 = arith.constant 0.000000e+00 : f32
      %12 = vector.broadcast %cst_10 : f32 to vector<8x128xf32>
      %c0_11 = arith.constant 0 : index
      %c0_12 = arith.constant 0 : index
      %13 = vector.load %arg6[%c0_11, %c0_12] : memref<8x128xf32, #tpu.memory_space<vmem>>, vector<8x128xf32>
      tpu.vector_store %arg6[%c0_11, %c0_12], %12 {strides = array<i32>} : memref<8x128xf32, #tpu.memory_space<vmem>>, vector<8x128xf32>,
    } else {
    }
    %c0 = arith.constant 0 : index
    %c0_1 = arith.constant 0 : index
    %3 = vector.load %arg6[%c0, %c0_1] : memref<8x128xf32, #tpu.memory_space<vmem>>, vector<8x128xf32>
    %c0_2 = arith.constant 0 : index
    %c0_3 = arith.constant 0 : index
    %4 = vector.load %arg2[%c0_2, %c0_3] : memref<8x128xbf16, #tpu.memory_space<vmem>>, vector<8x128xbf16>
    %c0_4 = arith.constant 0 : index
    %c0_5 = arith.constant 0 : index
    %5 = vector.load %arg3[%c0_4, %c0_5] : memref<128x128xbf16, #tpu.memory_space<vmem>>, vector<128x128xbf16>
    %cst = arith.constant dense<0.000000e+00> : vector<8x128xf32>
    %6 = tpu.matmul %4, %5, %cst {dimension_numbers = #tpu.dot_dimension_numbers<[1], [0], [0], [1], [0, 0, 1, 1], [], []>} : vector<8x128xbf16>, vector<128x128xbf16>, vector<8x128xf32> -> vector<8x128xf32>
    %7 = arith.addf %3, %6 : vector<8x128xf32>
    %c0_6 = arith.constant 0 : index
    %c0_7 = arith.constant 0 : index
    %8 = vector.load %arg6[%c0_6, %c0_7] : memref<8x128xf32, #tpu.memory_space<vmem>>, vector<8x128xf32>
    tpu.vector_store %arg6[%c0_6, %c0_7], %7 {strides = array<i32>} : memref<8x128xf32, #tpu.memory_space<vmem>>, vector<8x128xf32>,
    %c0_i32_8 = arith.constant 0 : i32
    %9 = arith.cmpi eq, %arg1, %c0_i32_8 : i32
    %10 = arith.extui %9 : i1 to i32
    %c0_i32_9 = arith.constant 0 : i32
    %11 = arith.cmpi ne, %10, %c0_i32_9 : i32
    scf.if %11 {
      %c0_10 = arith.constant 0 : index
      %c0_11 = arith.constant 0 : index
      %12 = vector.load %arg6[%c0_10, %c0_11] : memref<8x128xf32, #tpu.memory_space<vmem>>, vector<8x128xf32>
      %c0_12 = arith.constant 0 : index
      %c0_13 = arith.constant 0 : index
      %13 = vector.load %arg4[%c0_12, %c0_13] : memref<1x128xf32, #tpu.memory_space<vmem>>, vector<1x128xf32>
      %14 = vector.broadcast %13 : vector<1x128xf32> to vector<8x128xf32>
      %15 = arith.addf %12, %14 : vector<8x128xf32>
      %cst_14 = arith.constant dense<0xFF800000> : vector<8xf32>
      %16 = vector.multi_reduction <maximumf>, %15, %cst_14 [1] : vector<8x128xf32> to vector<8xf32>
      %17 = vector.shape_cast %16 : vector<8xf32> to vector<8x1xf32>
      %18 = vector.broadcast %17 : vector<8x1xf32> to vector<8x128xf32>
      %19 = arith.subf %15, %18 : vector<8x128xf32>
      %20 = math.exp %19 : vector<8x128xf32>
      %cst_15 = arith.constant dense<0.000000e+00> : vector<8xf32>
      %21 = vector.multi_reduction <add>, %20, %cst_15 [1] : vector<8x128xf32> to vector<8xf32>
      %22 = vector.shape_cast %21 : vector<8xf32> to vector<8x1xf32>
      %23 = math.log %22 : vector<8x1xf32>
      %24 = vector.broadcast %23 : vector<8x1xf32> to vector<8x128xf32>
      %25 = arith.subf %19, %24 : vector<8x128xf32>
      %c0_16 = arith.constant 0 : index
      %c0_17 = arith.constant 0 : index
      %26 = vector.load %arg5[%c0_16, %c0_17] : memref<8x128xf32, #tpu.memory_space<vmem>>, vector<8x128xf32>
      tpu.vector_store %arg5[%c0_16, %c0_17], %25 {strides = array<i32>} : memref<8x128xf32, #tpu.memory_space<vmem>>, vector<8x128xf32>,
    } else {
    }
    return
  }
  func.func @transform_0(%arg0: i32, %arg1: i32) -> (i32, i32) {
    %c0_i32 = arith.constant 0 : i32
    return %arg0, %arg1 : i32, i32
  }
  func.func @transform_1(%arg0: i32, %arg1: i32) -> (i32, i32) {
    %c0_i32 = arith.constant 0 : i32
    %c0_i32_0 = arith.constant 0 : i32
    return %arg1, %c0_i32 : i32, i32
  }
  func.func @transform_2(%arg0: i32, %arg1: i32) -> (i32, i32) {
    %c0_i32 = arith.constant 0 : i32
    %c0_i32_0 = arith.constant 0 : i32
    %c0_i32_1 = arith.constant 0 : i32
    return %c0_i32, %c0_i32_0 : i32, i32
  }
  func.func @transform_3(%arg0: i32, %arg1: i32) -> (i32, i32) {
    %c0_i32 = arith.constant 0 : i32
    %c0_i32_0 = arith.constant 0 : i32
    return %arg0, %c0_i32 : i32, i32
  }
}

</mosaic_0001>

<bundles_post_ra>
// kernel: tpu_custom_call.1
= control target key start
LH: loop header
LB: loop body
LE: loop exit
PB: predicated region body
PF: predicated region fallthrough
CT: control target
= control target key end

     0   :  { %8 = vsyncpa [#allocation4], 0  ;;  %s1003_s0 = inlined_call_operand.hbm [shape: bf16[16,128], index: 0, kind: input, shape index: {}]   ;;  %s1004_s1 = inlined_call_operand.hbm [shape: bf16[128,128], index: 1, kind: input, shape index: {}]   ;;  %s1005_s2 = inlined_call_operand.vmem [shape: f32[1,128], index: 2, kind: input, shape index: {}]   ;;  %s1006_s3 = inlined_call_operand.hbm [shape: f32[16,128], index: 3, kind: output, shape index: {}]  }
   0x1   :  { %10 = vsyncpa [#allocation4 + $0x1], 0 }
   0x2   :  { %11 = vsyncpa [#allocation7], 0 }
   0x3   :  { %12 = vsyncpa [#allocation5], 0 }
   0x4   :  { %14 = vsyncpa [#allocation5 + $0x1], 0  ;;  %s782_s12 = smov 0   ;;  %s784_s13 = smov 0  }
   0x5   :  { %s786_s14 = smov 0   ;;  %s788_s15 = smov 0  }
   0x6   :  { %s790_s16 = smov 0   ;;  %s792_s17 = smov 0  }
   0x7 LB: > { %s467_s18 = sadd.s32 4294967295, %s753_s17   ;;  %s468_s19 = sadd.s32 4294967294, %s753_s17   ;;  %s753_s17 = sphi %s792_s17, %s20_s17   ;;  %s749_s16 = sphi %s790_s16, %s1030_s16   ;;  %s745_s15 = sphi %s788_s15, %s1029_s15   ;;  %s741_s14 = sphi %s786_s14, %s1028_s14   ;;  %s737_s13 = sphi %s784_s13, %s1027_s13   ;;  %s733_s12 = sphi %s782_s12, %s1026_s12  }
   0x8   : > { %p54_p0 = scmp.ne.s32.totalorder %s737_s13, %s733_s12  ;;  %p816_p1 = scmp.eq.s32.totalorder %s467_s18, 0 }
   0x9   : > { %p820_p2 = scmp.eq.s32.totalorder %s467_s18, 1  ;;  %p131_p3 = scmp.eq.s32.totalorder %s468_s19, 1 }
   0xa   : > { %s1011_s20 = scalar_select %p816_p1, 1, 0 }
   0xb   : > { %s1012_s21 = scalar_select %p820_p2, 1, 0 }
   0xc   : > { %p826_p4 = por %p816_p1, %p54_p0  ;;  %p469_p5 = scmp.ge.s32.totalorder %s753_s17, 1 }
   0xd   : > { %p831_p6 = por %p131_p3, %p54_p0  ;;  %p138_p7 = scmp.lt.s32.totalorder %s753_s17, 3 }
   0xe   : > { %s1013_s22 = scalar_select %p826_p4, 1, 0 }
   0xf   : > { %s1014_s23 = scalar_select %p831_p6, 1, 0 }
  0x10   : > { %p836_p8 = pnand %p469_p5, %p138_p7  ;;  %s755_s25 = smov [#allocation6]  }
  0x11   : > { %s153_s26 = sshll.u32 %s755_s25, 4  ;;  %s32_s28 = sadd.s32 1, %s749_s16  ;;  %s154_s26 = int_to_ptr.vmem [resolvable:$true] %s153_s26 }
  0x12   : > { %s1015_s24 = scalar_select %p836_p8, 1, 0 }
  0x13   : > { %p528_p9 = pneg %p836_p8  ;;  %s609_s4 = scalar_lea.hbm %s1004_s1, 1024 }
  0x14   : > { %p610_p12 = scmp.ne.s32.totalorder %s1004_s1, %s609_s4  ;;  %p616_p5 = scmp.lt.u32.totalorder %s609_s4, %s1004_s1 }
  0x15   : > { %p845_p11 = pnand %p528_p9, %p816_p1 }
  0x17   : > { %p611_p13 = pneg %p845_p11 }
  0x19   : > { %p612_p0 = pnand %p611_p13, %p610_p12 }
  0x1b   : > { %p613_p3 = pneg %p612_p0 }
  0x1d   : > { %p618_p7 = pnand %p616_p5, %p613_p3 }
  0x1f   : > { %621 = shalt.err (!%p618_p7)
}
  0x20   : > { %s622_s9 = scalar_lea.vmem %s154_s26, 1024  ;;  %p630_p1 = scmp.lt.s32.totalorder %s154_s26, %s154_s26 }
  0x21   : > { %p623_p9 = scmp.ne.s32.totalorder %s154_s26, %s622_s9  ;;  %p631_p4 = scmp.lt.s32.totalorder %s622_s9, %s622_s9 }
  0x23   : > { %p625_p10 = pnand %p623_p9, %p611_p13  ;;  %p632_p8 = por %p631_p4, %p630_p1 }
  0x25   : > { %p626_p6 = pneg %p625_p10 }
  0x27   : > { %p633_p2 = pnand %p632_p8, %p626_p6 }
  0x29   : > { %636 = shalt.err (!%p633_p2)
}
  0x2a   : > { %s756_s10 = smov 64   ;;  %s757_s11 = smov 4  }
  0x2b   : > { %531 = dma.hbm_to_vmem [thread:$0]  (!%p845_p11), %s1004_s1, 1024, %s154_s26, [#allocation7], %s756_s10, %s756_s10, %s757_s11  }
  0x2c   : > { %p34_p1 = scmp.ge.s32.totalorder %s32_s28, 2  ;;  %s41_s25 = sadd.s32 1, %s741_s14 }
  0x2d   : > { %p48_p2 = scmp.ne.s32.totalorder %s741_s14, %s737_s13  ;;  %p49_p4 = scmp.eq.s32.totalorder %s753_s17, 0 }
  0x2e   : > { %s1032_s28 = smov (%p34_p1, %s32_s28), 0  ;;  %p1018_p8 = scmp.ne.s32.totalorder %s1012_s21, 0 }
  0x2f   : > { %p872_p6 = por %p49_p4, %p48_p2  ;;  %s36_s27 = ssub.s32 %s749_s16, %s1032_s28 }
  0x30   : > { %p878_p10 = por %p1018_p8, %p48_p2  ;;  %p541_p12 = scmp.lt.s32.totalorder %s753_s17, 2 }
  0x31   : > { %p39_p11 = scmp.eq.s32.totalorder %s36_s27, 0  ;;  %s170_s26 = sand.u32 1, %s741_s14  }
  0x32   : > { %s472_s4 = sshll.u32 %s170_s26, 2  ;;  %s473_s6 = sshll.u32 %s749_s16, 6 }
  0x33   : > { %s887_s5 = scalar_select %p39_p11, %s741_s14, %s41_s25  }
  0x34   : > { %s893_s9 = scalar_lea.hbm %s1003_s0, %s473_s6  ;;  %s174_s21 = scalar_lea.vmem [#allocation3], %s472_s4 }
  0x35   : > { %s182_s10 = sshll.u32 %s174_s21, 4  ;;  %p899_p13 = pnand %p541_p12, %p872_p6  ;;  %s895_s10 = int_to_ptr.vmem [resolvable:$true] %s182_s10 }
  0x36   : > { %s171_s18 = scalar_lea.sflag [#allocation4], %s170_s26  ;;  %s637_s19 = scalar_lea.hbm %s893_s9, 64 }
  0x37   : > { %p638_p0 = scmp.ne.s32.totalorder %s893_s9, %s637_s19  ;;  %p639_p3 = pneg %p899_p13 }
  0x38   : > { %s642_s4 = scalar_lea.hbm %s1003_s0, 128  ;;  %p643_p9 = scmp.lt.u32.totalorder %s893_s9, %s1003_s0 }
  0x39   : > { %p640_p5 = pnand %p639_p3, %p638_p0  ;;  %p644_p1 = scmp.lt.u32.totalorder %s642_s4, %s637_s19 }
  0x3a   : > { %p646_p4 = scmp.lt.u32.totalorder %s637_s19, %s893_s9 }
  0x3b   : > { %p641_p7 = pneg %p640_p5  ;;  %p645_p2 = por %p644_p1, %p643_p9 }
  0x3d   : > { %p647_p6 = por %p646_p4, %p645_p2 }
  0x3f   : > { %p648_p8 = pnand %p647_p6, %p641_p7 }
  0x41   : > { %651 = shalt.err (!%p648_p8)
}
  0x42   : > { %s652_s26 = scalar_lea.vmem %s895_s10, 64  ;;  %s758_s7 = smov [#allocation3]  }
  0x43   : > { %p653_p12 = scmp.ne.s32.totalorder %s895_s10, %s652_s26  ;;  %s657_s8 = sshll.u32 %s758_s7, 4  ;;  %s658_s8 = int_to_ptr.vmem [resolvable:$false] %s657_s8 }
  0x44   : > { %s659_s21 = scalar_lea.vmem %s658_s8, 128  ;;  %p660_p5 = scmp.lt.s32.totalorder %s895_s10, %s658_s8 }
  0x45   : > { %p655_p11 = pnand %p653_p12, %p639_p3  ;;  %p661_p9 = scmp.lt.s32.totalorder %s659_s21, %s652_s26 }
  0x47   : > { %p656_p0 = pneg %p655_p11  ;;  %p662_p1 = por %p661_p9, %p660_p5 }
  0x49   : > { %p663_p2 = pnand %p662_p1, %p656_p0 }
  0x4b   : > { %666 = shalt.err (!%p663_p2)
}
  0x4c   : > { %535 = dma.hbm_to_vmem [thread:$0]  (!%p899_p13), %s893_s9, 64, %s895_s10, %s171_s18  }
  0x4d   : > { %p1021_p7 = scmp.ne.s32.totalorder %s1015_s24, 0 }
  0x4e   : > { %s931_s19 = sand.u32 (!%p1021_p7), 1, %s737_s13   ;;  %p1022_p3 = scmp.ne.s32.totalorder (!%p1021_p7), %s1013_s22, 0 }
  0x4f   : > { %191 = sbr.rel (%p1021_p7) target bundleno = 665 (0x299), region = 32  ;;  %s475_s25 = sshll.u32 (!%p1021_p7), %s931_s19, 2 }
  0x50   : > { %s194_s27 = scalar_lea.sflag (!%p1021_p7), [#allocation4], %s931_s19  ;;  %s935_s4 = scalar_lea.vmem (!%p1021_p7), [#allocation3], %s475_s25 }
  0x56   : > { %720 = dma.done.wait (%p1022_p3), %s194_s27, 64  }
  0x57   : > { %722 = vsyncadd (%p1022_p3), %s194_s27, 4294967232  ;;  %p1023_p13 = scmp.ne.s32.totalorder %s1011_s20, 0 }
  0x59   : > { %724 = dma.done.wait (%p1023_p13), [#allocation7], 1024  }
  0x5a   : > { %726 = vsyncadd (%p1023_p13), [#allocation7], 4294966272  ;;  %v759_v0 = vmov 0.0   ;;  %vm760_vm0 = vmmov 0   ;;  %v597_v1 = vld [vmem:[#allocation6] sm:$0xff]   ;;  %v598_v2 = vld [vmem:[#allocation6 + $0x8] sm:$0xff]  }
  0x5b   : > { %500 = vmatprep.subr.bf16.mxu0 %v759_v0  ;;  %516 = vmatprep.mubr.msk.bf16.mxu0 %vm760_vm0, %v759_v0  ;;  %v599_v3 = vld [vmem:[#allocation6 + $0x10] sm:$0xff]   ;;  %v600_v4 = vld [vmem:[#allocation6 + $0x18] sm:$0xff]   ;;  %v601_v5 = vld [vmem:[#allocation6 + $0x20] sm:$0xff]   ;;  %s477_s24 = sshll.u32 %s931_s19, 3  ;;  %s488_s9 = sshll.u32 %s745_s15, 7 }
  0x5c   : > { %501 = vmatpush3.bf16.msra.mxu0 %v597_v1  ;;  %v602_v6 = vld [vmem:[#allocation6 + $0x28] sm:$0xff]   ;;  %v603_v7 = vld [vmem:[#allocation6 + $0x30] sm:$0xff]   ;;  %v604_v8 = vld [vmem:[#allocation6 + $0x38] sm:$0xff]   ;;  %s223_s10 = scalar_lea.vmem [#allocation8], %s477_s24  ;;  %s954_s6 = scalar_lea.hbm %s1006_s3, %s488_s9 }
  0x5d   : > { %502 = vmatprep.subr.bf16.mxu0 %v759_v0  ;;  %v232_v9 = vld [vmem:[%s935_s4] sm:$0xf]  ;;  %s376_s11 = sshll.u32 %s223_s10, 4  ;;  %s363_s26 = scalar_lea.sflag [#allocation5], %s931_s19  ;;  %s956_s11 = int_to_ptr.vmem [resolvable:$true] %s376_s11 }
  0x5e   : > { %v486_v10 = vld [vmem:[%s1005_s2] ss:$0 sm:$0xff]  ;;  %s667_s7 = scalar_lea.vmem %s956_s11, 128  ;;  %s761_s15 = smov [#allocation8]  }
  0x5f   : > { %p668_p4 = scmp.ne.s32.totalorder %s956_s11, %s667_s7  ;;  %s671_s8 = sshll.u32 %s761_s15, 4  ;;  %s672_s8 = int_to_ptr.vmem [resolvable:$false] %s671_s8 }
  0x60   : > { %503 = vmatpush3.bf16.msra.mxu0 %v598_v2  ;;  %s673_s21 = scalar_lea.vmem %s672_s8, 256  ;;  %p674_p12 = scmp.lt.s32.totalorder %s956_s11, %s672_s8 }
  0x61   : > { %504 = vmatprep.subr.bf16.mxu0 %v759_v0  ;;  %p669_p6 = pnand %p668_p4, %p878_p10  ;;  %p675_p11 = scmp.lt.s32.totalorder %s673_s21, %s667_s7 }
  0x63   : > { %p670_p8 = pneg %p669_p6  ;;  %p676_p0 = por %p675_p11, %p674_p12 }
  0x64   : > { %505 = vmatpush3.bf16.msra.mxu0 %v599_v3 }
  0x65   : > { %506 = vmatprep.subr.bf16.mxu0 %v759_v0  ;;  %p677_p5 = pnand %p676_p0, %p670_p8 }
  0x68   : > { %507 = vmatpush3.bf16.msra.mxu0 %v600_v4 }
  0x69   : > { %508 = vmatprep.subr.bf16.mxu0 %v759_v0 }
  0x6c   : > { %509 = vmatpush3.bf16.msra.mxu0 %v601_v5 }
  0x6d   : > { %510 = vmatprep.subr.bf16.mxu0 %v759_v0 }
  0x70   : > { %511 = vmatpush3.bf16.msra.mxu0 %v602_v6 }
  0x71   : > { %512 = vmatprep.subr.bf16.mxu0 %v759_v0 }
  0x74   : > { %513 = vmatpush3.bf16.msra.mxu0 %v603_v7 }
  0x75   : > { %514 = vmatprep.subr.bf16.mxu0 %v759_v0 }
  0x78   : > { %515 = vmatpush3.bf16.msra.mxu0 %v604_v8 }
  0x7b   : > { %517 = vmatmul.mubr.bf16.vlgmr.msra.gmra.mrb[0].mxu0 %v232_v9 }
 0x14e   : > { %v331_v11 = vpop.f32.mrb[0].mxu0 }
 0x14f   : > { %v350_v12 = vadd.f32 %v486_v10, %v331_v11  ;;  %v518_v13 = vpop.f32.mrb[1].mxu0 }
 0x150   : > { %v334_v14 = vpop.f32.mrb[2].mxu0 }
 0x151   : > { %351 = vmax.xlane.f32.xlu0 %v350_v12  ;;  %v519_v15 = vpop.f32.mrb[3].mxu0 }
 0x1de   : > { %v352_v16 = vpop.xlane.xlu0 %351 }
 0x1df   : > { %v353_v17 = vsub.f32 %v350_v12, %v352_v16 }
 0x1e1   : > { %v354_v18 = vmul.f32 1.442695, %v353_v17 }
 0x1e3   : > { %605 = vpow2.f32 %v354_v18 }
 0x1ed   : > { %v606_v19 = vpop.eup %605 }
 0x1ee   : > { %356 = vadd.xlane.f32.xlu0 %v606_v19 }
 0x27b   : > { %v357_v20 = vpop.xlane.xlu0 %356 }
 0x27c   : > { %607 = vlog2.f32 %v357_v20 }
 0x286   : > { %v608_v21 = vpop.eup %607 }
 0x287   : > { %v359_v22 = vmul.f32 0.6931472, %v608_v21 }
 0x289   : > { %v360_v23 = vsub.f32 %v353_v17, %v359_v22 }
 0x28b   : > { %361 = vst [vmem:[%s223_s10] sm:$0xff] %v360_v23 }
 0x28c   : > { %680 = shalt.err (!%p677_p5)
}
 0x28d   : > { %s681_s19 = scalar_lea.hbm %s954_s6, 128  ;;  %s685_s4 = scalar_lea.hbm %s1006_s3, 256 }
 0x28e   : > { %p682_p9 = scmp.ne.s32.totalorder %s954_s6, %s681_s19  ;;  %p686_p7 = scmp.lt.u32.totalorder %s954_s6, %s1006_s3 }
 0x28f   : > { %p687_p3 = scmp.lt.u32.totalorder %s685_s4, %s681_s19  ;;  %p689_p4 = scmp.lt.u32.totalorder %s681_s19, %s954_s6 }
 0x290   : > { %p683_p1 = pnand %p682_p9, %p878_p10 }
 0x291   : > { %p688_p13 = por %p687_p3, %p686_p7 }
 0x292   : > { %p684_p2 = pneg %p683_p1 }
 0x293   : > { %p690_p6 = por %p689_p4, %p688_p13 }
 0x295   : > { %p691_p8 = pnand %p690_p6, %p684_p2 }
 0x297   : > { %694 = shalt.err (!%p691_p8)
}
 0x298   : > { %526 = dma.vmem_to_hbm [thread:$0]  (%p878_p10), %s956_s11, 128, %s954_s6, %s363_s26  }
 0x299 PF: > { %s388_s24 = sand.u32 1, %s733_s12   ;;  %p1024_p12 = scmp.ne.s32.totalorder %s1014_s23, 0 }
 0x29a   : > { %p1025_p11 = scmp.ge.s32.totalorder %s753_s17, 2  ;;  %s389_s9 = scalar_lea.sflag [#allocation5], %s388_s24 }
 0x29c   : > { %p537_p0 = pnand %p1025_p11, %p1024_p12 }
 0x29e   : > { %728 = dma.done.wait (!%p537_p0), %s389_s9, 128  }
 0x29f   : > { %730 = vsyncadd (!%p537_p0), %s389_s9, 4294967168  ;;  %s20_s17 = sadd.s32 1, %s753_s17   ;;  %s1026_s12 = smov %s737_s13 }
 0x2a0   : > { %p17_p5 = scmp.ge.s32.totalorder %s20_s17, 4   ;;  %s1027_s13 = smov %s741_s14 }
 0x2a1   : > { %s1028_s14 = smov %s887_s5  ;;  %s1029_s15 = smov %s749_s16 }
 0x2a2   : > { %s1030_s16 = smov %s1032_s28  ;;  %19 = sbr.rel (!%p17_p5) target bundleno = 7 (0x7), region = 90 }
 0x2a9   :  { %394 = vsyncpa [#allocation4], 1 }
 0x2aa   :  { %396 = vsyncpa [#allocation4 + $0x1], 1 }
 0x2ab   :  { %397 = vsyncpa [#allocation7], 1 }
 0x2ac   :  { %398 = vsyncpa [#allocation5], 1 }
 0x2ad   :  { %400 = vsyncpa [#allocation5 + $0x1], 1 }

</bundles_post_ra>
